<compile_context>
chip_gen: v7x
topology: tpu7x:2x2x1
jax: 0.10.0
libtpu: 0.0.40
codegen_flags: <defaults>
</compile_context>

<pallas_src>
import functools

import jax
import jax.numpy as jnp
from jax.experimental import pallas as pl
from jax.experimental.pallas import tpu as pltpu


def _default_vmem_limit_bytes():
    """Modest scoped-VMEM request; tile sizing is capped separately."""
    kind = ""
    try:
        kind = jax.devices()[0].device_kind.lower()
    except Exception:
        pass
    if "v7" in kind:
        return 32 * 1024 * 1024          # v7x: 64 MiB physical per TC -> leave headroom
    return 64 * 1024 * 1024              # v5e/v6e (128 MiB physical) / unknown


def _choose_tile_n(n, c, itemsize, sublane, vmem_limit):
    """Row-tile size: sublane-aligned, capped, VMEM-safe, keeps the grid long."""
    if n <= sublane:
        # Single block covering the full (small) row dim; full-array-dim blocks
        # are legal even when not sublane-aligned.
        return int(max(n, 1))
    # Per grid step: double-buffered in + out tiles (I/O dtype) plus ~2
    # full-tile f32 temporaries (x cast, fused result).
    bytes_per_row = c * (4 * itemsize + 2 * 4)
    budget_rows = max(sublane, int(vmem_limit * 0.5) // max(bytes_per_row, 1))
    # ~85% of the HBM roofline is already reached at 512-1024-row tiles;
    # bigger tiles only shorten the grid and kill prefetch/writeback overlap.
    cap = 1024
    # Aim for >= ~8 grid steps when N allows it (per-core pipelining and
    # load balance across v7x's two TensorCores).
    split = pl.cdiv(pl.cdiv(n, 8), sublane) * sublane
    tile_n = min(budget_rows, cap, max(split, sublane))
    tile_n = max(sublane, (tile_n // sublane) * sublane)
    return int(tile_n)


def _layernorm_kernel(x_ref, w_ref, b_ref, o_ref, *, eps, use_approx_recip):
    # x_ref/o_ref: (tile_n, C); w_ref/b_ref: (1, C). All compute in f32.
    x = x_ref[...].astype(jnp.float32)
    inv_c = jnp.float32(1.0 / x.shape[-1])

    # Single-pass moments: one read of the tile, column-shaped statistics.
    s1 = jnp.sum(x, axis=-1, keepdims=True)
    s2 = jnp.sum(x * x, axis=-1, keepdims=True)
    mean = s1 * inv_c
    var = jnp.maximum(s2 * inv_c - mean * mean, 0.0)   # clamp: cancellation safety
    std = jnp.sqrt(var)
    denom = std + jnp.float32(eps)

    if use_approx_recip:
        # EUP approx reciprocal: fine for bf16/low-precision outputs.
        inv = pl.reciprocal(denom, approx=True)
    else:
        # Exact: a (tile_n, 1) column divide is essentially free vs. HBM time.
        inv = 1.0 / denom

    w = w_ref[...].astype(jnp.float32)
    b = b_ref[...].astype(jnp.float32)
    o_ref[...] = ((x - mean) * inv * w + b).astype(o_ref.dtype)


def layer_norm(x, weight=None, bias=None, eps=1e-5, *, tile_n=None):
    """LayerNorm over the last (feature) dim of a 2D input (N, C)."""
    assert x.ndim == 2, "expected (N, C) input"
    N, C = x.shape
    dtype = x.dtype
    if weight is None:
        weight = jnp.ones((C,), dtype=dtype)
    if bias is None:
        bias = jnp.zeros((C,), dtype=dtype)

    itemsize = jnp.dtype(dtype).itemsize
    sublane = {4: 8, 2: 16, 1: 32}.get(itemsize, 8)
    vmem_limit = _default_vmem_limit_bytes()

    if tile_n is None:
        tile_n = _choose_tile_n(N, C, itemsize, sublane, vmem_limit)
    else:
        tile_n = int(tile_n)
        if N <= sublane or tile_n >= N:
            tile_n = min(tile_n, N) if N <= sublane else max(sublane, (min(tile_n, N) // sublane) * sublane)
        else:
            tile_n = max(sublane, (tile_n // sublane) * sublane)

    grid = (pl.cdiv(N, tile_n),)
    kernel = functools.partial(
        _layernorm_kernel,
        eps=float(eps),
        use_approx_recip=(itemsize < 4),   # exact recip for f32, approx for bf16/fp8
    )

    out = pl.pallas_call(
        kernel,
        out_shape=jax.ShapeDtypeStruct((N, C), dtype),
        grid_spec=pltpu.PrefetchScalarGridSpec(
            num_scalar_prefetch=0,
            grid=grid,
            in_specs=[
                pl.BlockSpec((tile_n, C), lambda i: (i, 0)),   # ragged last block OK
                pl.BlockSpec((1, C), lambda i: (0, 0)),        # weight, VMEM-resident
                pl.BlockSpec((1, C), lambda i: (0, 0)),        # bias, VMEM-resident
            ],
            out_specs=pl.BlockSpec((tile_n, C), lambda i: (i, 0)),
        ),
        compiler_params=pltpu.CompilerParams(
            dimension_semantics=("parallel",),
            vmem_limit_bytes=int(vmem_limit),
        ),
    )(x, weight.reshape(1, C), bias.reshape(1, C))
    return out


def _reference(x, weight, bias, eps):
    mean = jnp.mean(x, axis=-1, keepdims=True)
    std = jnp.sqrt(jnp.mean((x - mean) ** 2, axis=-1, keepdims=True))
    return weight * (x - mean) / (std + eps) + bias


if __name__ == "__main__":
    key = jax.random.PRNGKey(0)
    eps = 1e-5

    # Case 1: toy shape matching the module docstring (batch_size x num_features),
    # feature dim not a multiple of 128 (full-C block, masked vst).
    N, C = 8, 32
    k1, k2 = jax.random.split(key)
    x = jax.random.normal(k1, (N, C), dtype=jnp.float32)
    weight = jnp.ones((C,), dtype=jnp.float32)    # reset_parameters: weight=1, bias=0
    bias = jnp.zeros((C,), dtype=jnp.float32)

    out = jax.block_until_ready(layer_norm(x, weight, bias, eps))
    ref = _reference(x, weight, bias, eps)
    assert out.shape == ref.shape
    assert jnp.allclose(out, ref, atol=1e-4, rtol=1e-4), "mismatch vs reference (case 1)"

    # Case 2: ragged rows (N % tile_n != 0), lane-dense C, multi-step grid,
    # non-zero mean input (exercises the single-pass-moments path).
    N2, C2 = 37, 256
    x2 = jax.random.normal(k2, (N2, C2), dtype=jnp.float32) * 2.0 + 0.5
    out2 = jax.block_until_ready(layer_norm(x2, eps=eps))   # no learnable params
    ref2 = _reference(x2, jnp.ones((C2,), jnp.float32), jnp.zeros((C2,), jnp.float32), eps)
    assert out2.shape == ref2.shape
    assert jnp.allclose(out2, ref2, atol=1e-4, rtol=1e-4), "mismatch vs reference (case 2)"

    print("KERNEL_OK")
</pallas_src>

<mosaic_0001>
module attributes {stable_mosaic.version = 11 : i64} {
  func.func @_layernorm_kernel(%arg0: i32, %arg1: memref<8x32xf32, #tpu.memory_space<vmem>>, %arg2: memref<1x32xf32, #tpu.memory_space<vmem>>, %arg3: memref<1x32xf32, #tpu.memory_space<vmem>>, %arg4: memref<8x32xf32, #tpu.memory_space<vmem>>) attributes {dimension_semantics = [#tpu.dimension_semantics<parallel>], iteration_bounds = array<i64: 1>, scalar_prefetch = 0 : i64, scratch_operands = 0 : i64, tpu.core_type = #tpu.core_type<tc>, window_params = [{transform_indices = @transform_0, window_bounds = array<i64: 8, 32>}, {pipeline_mode = #tpu.pipeline_mode<synchronous>, transform_indices = @transform_1, window_bounds = array<i64: 1, 32>}, {pipeline_mode = #tpu.pipeline_mode<synchronous>, transform_indices = @transform_2, window_bounds = array<i64: 1, 32>}, {transform_indices = @transform_3, window_bounds = array<i64: 8, 32>}]} {
    %c0 = arith.constant 0 : index
    %c0_0 = arith.constant 0 : index
    %0 = vector.load %arg1[%c0, %c0_0] : memref<8x32xf32, #tpu.memory_space<vmem>>, vector<8x32xf32>
    %cst = arith.constant dense<0.000000e+00> : vector<8xf32>
    %1 = vector.multi_reduction <add>, %0, %cst [1] : vector<8x32xf32> to vector<8xf32>
    %2 = vector.shape_cast %1 : vector<8xf32> to vector<8x1xf32>
    %3 = arith.mulf %0, %0 : vector<8x32xf32>
    %cst_1 = arith.constant dense<0.000000e+00> : vector<8xf32>
    %4 = vector.multi_reduction <add>, %3, %cst_1 [1] : vector<8x32xf32> to vector<8xf32>
    %5 = vector.shape_cast %4 : vector<8xf32> to vector<8x1xf32>
    %cst_2 = arith.constant 3.125000e-02 : f32
    %6 = vector.broadcast %cst_2 : f32 to vector<8x1xf32>
    %7 = arith.mulf %2, %6 : vector<8x1xf32>
    %cst_3 = arith.constant 3.125000e-02 : f32
    %8 = vector.broadcast %cst_3 : f32 to vector<8x1xf32>
    %9 = arith.mulf %5, %8 : vector<8x1xf32>
    %10 = arith.mulf %7, %7 : vector<8x1xf32>
    %11 = arith.subf %9, %10 : vector<8x1xf32>
    %cst_4 = arith.constant 0.000000e+00 : f32
    %12 = vector.broadcast %cst_4 : f32 to vector<8x1xf32>
    %13 = arith.maximumf %11, %12 : vector<8x1xf32>
    %14 = math.sqrt %13 : vector<8x1xf32>
    %cst_5 = arith.constant 9.99999974E-6 : f32
    %15 = vector.broadcast %cst_5 : f32 to vector<8x1xf32>
    %16 = arith.addf %14, %15 : vector<8x1xf32>
    %cst_6 = arith.constant 1.000000e+00 : f32
    %17 = vector.broadcast %cst_6 : f32 to vector<8x1xf32>
    %18 = arith.divf %17, %16 : vector<8x1xf32>
    %c0_7 = arith.constant 0 : index
    %c0_8 = arith.constant 0 : index
    %19 = vector.load %arg2[%c0_7, %c0_8] : memref<1x32xf32, #tpu.memory_space<vmem>>, vector<1x32xf32>
    %c0_9 = arith.constant 0 : index
    %c0_10 = arith.constant 0 : index
    %20 = vector.load %arg3[%c0_9, %c0_10] : memref<1x32xf32, #tpu.memory_space<vmem>>, vector<1x32xf32>
    %21 = vector.broadcast %7 : vector<8x1xf32> to vector<8x32xf32>
    %22 = arith.subf %0, %21 : vector<8x32xf32>
    %23 = vector.broadcast %18 : vector<8x1xf32> to vector<8x32xf32>
    %24 = arith.mulf %22, %23 : vector<8x32xf32>
    %25 = vector.broadcast %19 : vector<1x32xf32> to vector<8x32xf32>
    %26 = arith.mulf %24, %25 : vector<8x32xf32>
    %27 = vector.broadcast %20 : vector<1x32xf32> to vector<8x32xf32>
    %28 = arith.addf %26, %27 : vector<8x32xf32>
    %c0_11 = arith.constant 0 : index
    %c0_12 = arith.constant 0 : index
    %29 = vector.load %arg4[%c0_11, %c0_12] : memref<8x32xf32, #tpu.memory_space<vmem>>, vector<8x32xf32>
    tpu.vector_store %arg4[%c0_11, %c0_12], %28 {strides = array<i32>} : memref<8x32xf32, #tpu.memory_space<vmem>>, vector<8x32xf32>,
    return
  }
  func.func @transform_0(%arg0: i32) -> (i32, i32) {
    %c0_i32 = arith.constant 0 : i32
    %c0_i32_0 = arith.constant 0 : i32
    return %arg0, %c0_i32 : i32, i32
  }
  func.func @transform_1(%arg0: i32) -> (i32, i32) {
    %c0_i32 = arith.constant 0 : i32
    %c0_i32_0 = arith.constant 0 : i32
    %c0_i32_1 = arith.constant 0 : i32
    return %c0_i32, %c0_i32_0 : i32, i32
  }
  func.func @transform_2(%arg0: i32) -> (i32, i32) {
    %c0_i32 = arith.constant 0 : i32
    %c0_i32_0 = arith.constant 0 : i32
    %c0_i32_1 = arith.constant 0 : i32
    return %c0_i32, %c0_i32_0 : i32, i32
  }
  func.func @transform_3(%arg0: i32) -> (i32, i32) {
    %c0_i32 = arith.constant 0 : i32
    %c0_i32_0 = arith.constant 0 : i32
    return %arg0, %c0_i32 : i32, i32
  }
}

</mosaic_0001>

<bundles_post_ra>
// kernel: tpu_custom_call.1
= control target key start
LH: loop header
LB: loop body
LE: loop exit
PB: predicated region body
PF: predicated region fallthrough
CT: control target
= control target key end

     0   :  { %8 = vsyncpa [#allocation3], 0  ;;  %s288_s0 = inlined_call_operand.hbm [shape: f32[8,32], index: 0, kind: input, shape index: {}]   ;;  %s289_s1 = inlined_call_operand.hbm [shape: f32[1,32], index: 1, kind: input, shape index: {}]   ;;  %s290_s2 = inlined_call_operand.hbm [shape: f32[1,32], index: 2, kind: input, shape index: {}]   ;;  %s291_s3 = inlined_call_operand.hbm [shape: f32[8,32], index: 3, kind: output, shape index: {}]  }
   0x1   :  { %9 = vsyncpa [#allocation6], 0 }
   0x2   :  { %10 = vsyncpa [#allocation4], 0  ;;  %s213_s12 = smov [#allocation5]   ;;  %s214_s14 = smov [#allocation2]  }
   0x3   :  { %s27_s13 = sshll.u32 %s213_s12, 4  ;;  %s17_s15 = sshll.u32 %s214_s14, 4  ;;  %s28_s13 = int_to_ptr.vmem [resolvable:$true] %s27_s13  ;;  %s18_s15 = int_to_ptr.vmem [resolvable:$true] %s17_s15 }
   0x4   :  { %s119_s18 = scalar_lea.hbm %s289_s1, 16 }
   0x5   :  { %p120_p0 = scmp.ne.s32.totalorder %s289_s1, %s119_s18  ;;  %p123_p1 = scmp.lt.u32.totalorder %s119_s18, %s289_s1 }
   0x7   :  { %p125_p2 = pnand %p123_p1, %p120_p0 }
   0x9   :  { %128 = shalt.err (!%p125_p2)
}
   0xa   :  { %s129_s23 = scalar_lea.vmem %s28_s13, 16  ;;  %s133_s24 = scalar_lea.vmem %s28_s13, 32 }
   0xb   :  { %p130_p3 = scmp.ne.s32.totalorder %s28_s13, %s129_s23  ;;  %p134_p4 = scmp.lt.s32.totalorder %s28_s13, %s28_s13 }
   0xc   :  { %p135_p5 = scmp.lt.s32.totalorder %s133_s24, %s129_s23 }
   0xe   :  { %p136_p6 = por %p135_p5, %p134_p4 }
  0x10   :  { %p137_p7 = pnand %p136_p6, %p130_p3 }
  0x12   :  { %140 = shalt.err (!%p137_p7)
}
  0x13   :  { %30 = dma.hbm_to_vmem [thread:$0]  %s289_s1, 16, %s28_s13, [#allocation6]  }
  0x14   :  { %s141_s29 = scalar_lea.hbm %s288_s0, 128 }
  0x15   :  { %p142_p8 = scmp.ne.s32.totalorder %s288_s0, %s141_s29  ;;  %p145_p9 = scmp.lt.u32.totalorder %s141_s29, %s288_s0 }
  0x17   :  { %p147_p10 = pnand %p145_p9, %p142_p8 }
  0x19   :  { %150 = shalt.err (!%p147_p10)
}
  0x1a   :  { %s151_s7 = scalar_lea.vmem %s18_s15, 128  ;;  %p156_p12 = scmp.lt.s32.totalorder %s18_s15, %s18_s15 }
  0x1b   :  { %p152_p11 = scmp.ne.s32.totalorder %s18_s15, %s151_s7  ;;  %p157_p13 = scmp.lt.s32.totalorder %s151_s7, %s151_s7 }
  0x1d   :  { %p158_p0 = por %p157_p13, %p156_p12 }
  0x1f   :  { %p159_p1 = pnand %p158_p0, %p152_p11 }
  0x21   :  { %162 = shalt.err (!%p159_p1)
}
  0x22   :  { %20 = dma.hbm_to_vmem [thread:$0]  %s288_s0, 128, %s18_s15, [#allocation3]  }
  0x23   :  { %s215_s9 = smov [#allocation7]   ;;  %s163_s13 = scalar_lea.hbm %s290_s2, 16 }
  0x24   :  { %s37_s10 = sshll.u32 %s215_s9, 4  ;;  %p164_p2 = scmp.ne.s32.totalorder %s290_s2, %s163_s13  ;;  %s38_s10 = int_to_ptr.vmem [resolvable:$true] %s37_s10 }
  0x25   :  { %p167_p3 = scmp.lt.u32.totalorder %s163_s13, %s290_s2 }
  0x27   :  { %p169_p4 = pnand %p167_p3, %p164_p2 }
  0x29   :  { %172 = shalt.err (!%p169_p4)
}
  0x2a   :  { %s173_s19 = scalar_lea.vmem %s38_s10, 16  ;;  %s177_s0 = scalar_lea.vmem %s38_s10, 32 }
  0x2b   :  { %p174_p5 = scmp.ne.s32.totalorder %s38_s10, %s173_s19  ;;  %p178_p6 = scmp.lt.s32.totalorder %s38_s10, %s38_s10 }
  0x2c   :  { %p179_p7 = scmp.lt.s32.totalorder %s177_s0, %s173_s19 }
  0x2e   :  { %p180_p8 = por %p179_p7, %p178_p6 }
  0x30   :  { %p181_p9 = pnand %p180_p8, %p174_p5 }
  0x32   :  { %184 = shalt.err (!%p181_p9)
}
  0x33   :  { %40 = dma.hbm_to_vmem [thread:$0]  %s290_s2, 16, %s38_s10, [#allocation6]  }
  0x34   :  { %207 = dma.done.wait [#allocation3], 128  }
  0x35   :  { %208 = vsyncadd [#allocation3], 4294967168 }
  0x36   :  { %209 = dma.done.wait [#allocation6], 32  }
  0x37   :  { %210 = vsyncadd [#allocation6], 4294967264  ;;  %vm51_vm0 = vcmask 261120   ;;  %v50_v0 = vld [vmem:[#allocation2] sm:$0xff]  ;;  %v109_v19 = vld [vmem:[#allocation5] ss:$0 sm:$0xff] }
  0x38   :  { %v52_v1 = vsel %vm51_vm0, %v50_v0, 0.0  ;;  %v55_v2 = vmul.f32 %v50_v0, %v50_v0  ;;  %v110_v21 = vld [vmem:[#allocation7] ss:$0 sm:$0xff]  ;;  %s216_s2 = smov [#allocation8]  }
  0x39   :  { %53 = vadd.xlane.f32.xlu0 %v52_v1  ;;  %s99_s21 = sshll.u32 %s216_s2, 4  ;;  %s100_s21 = int_to_ptr.vmem [resolvable:$true] %s99_s21 }
  0x3a   :  { %v56_v3 = vsel %vm51_vm0, %v55_v2, 0.0  ;;  %s185_s22 = scalar_lea.vmem %s100_s21, 128  ;;  %p190_p11 = scmp.lt.s32.totalorder %s100_s21, %s100_s21 }
  0x3b   :  { %p186_p10 = scmp.ne.s32.totalorder %s100_s21, %s185_s22  ;;  %p191_p12 = scmp.lt.s32.totalorder %s185_s22, %s185_s22 }
  0x3d   :  { %57 = vadd.xlane.f32.xlu0 %v56_v3  ;;  %p192_p13 = por %p191_p12, %p190_p11 }
  0x3f   :  { %p193_p0 = pnand %p192_p13, %p186_p10 }
  0xc6   :  { %v54_v4 = vpop.xlane.xlu0 %53 }
  0xc7   :  { %v59_v5 = vmul.f32 0.03125, %v54_v4 }
  0xc9   :  { %v61_v7 = vmul.f32 %v59_v5, %v59_v5  ;;  %v76_v17 = vsub.f32 %v50_v0, %v59_v5 }
  0xca   :  { %v58_v6 = vpop.xlane.xlu0 %57 }
  0xcb   :  { %v60_v8 = vmul.f32 0.03125, %v58_v6 }
  0xcd   :  { %v62_v9 = vsub.f32 %v60_v8, %v61_v7 }
  0xcf   :  { %v63_v10 = vmax.f32 %v62_v9, 0.0 }
  0xd1   :  { %115 = vrsqrt.f32 %v63_v10  ;;  %vm66_vm1 = vcmp.eq.f32.partialorder %v63_v10, inf  ;;  %v69_v13 = vand.u32 2147483648, %v63_v10  ;;  %vm68_vm2 = vcmp.eq.f32.partialorder %v63_v10, 0.0 }
  0xdb   :  { %v116_v11 = vpop.eup %115 }
  0xdc   :  { %v65_v12 = vmul.f32 %v116_v11, %v63_v10 }
  0xde   :  { %v67_v14 = vsel %vm66_vm1, %v63_v10, %v65_v12 }
  0xdf   :  { %v70_v15 = vsel %vm68_vm2, %v69_v13, %v67_v14 }
  0xe0   :  { %v71_v16 = vadd.f32 1e-05, %v70_v15 }
  0xe2   :  { %117 = vrcp.f32 %v71_v16 }
  0xec   :  { %v118_v18 = vpop.eup %117 }
  0xed   :  { %v77_v20 = vmul.f32 %v118_v18, %v76_v17 }
  0xef   :  { %v84_v22 = vmul.f32 %v109_v19, %v77_v20 }
  0xf1   :  { %v91_v23 = vadd.f32 %v110_v21, %v84_v22 }
  0xf3   :  { %92 = vst.msk [vmem:[#allocation8] sm:$0xff] %vm51_vm0, %v91_v23 }
  0xf4   :  { %196 = shalt.err (!%p193_p0)
}
  0xf5   :  { %s197_s25 = scalar_lea.hbm %s291_s3, 128 }
  0xf6   :  { %p198_p1 = scmp.ne.s32.totalorder %s291_s3, %s197_s25  ;;  %p201_p2 = scmp.lt.u32.totalorder %s197_s25, %s291_s3 }
  0xf8   :  { %p203_p3 = pnand %p201_p2, %p198_p1 }
  0xfa   :  { %206 = shalt.err (!%p203_p3)
}
  0xfb   :  { %102 = dma.vmem_to_hbm [thread:$0]  %s100_s21, 128, %s291_s3, [#allocation4]  }
  0xfc   :  { %211 = dma.done.wait [#allocation4], 128  }
  0xfd   :  { %212 = vsyncadd [#allocation4], 4294967168 }
  0xfe   :  { %106 = vsyncpa [#allocation3], 1 }
  0xff   :  { %107 = vsyncpa [#allocation6], 1 }
 0x100   :  { %108 = vsyncpa [#allocation4], 1 }

</bundles_post_ra>
